<compile_context>
chip_gen: v6e
topology: v6e:2x2x1
jax: 0.10.0
libtpu: 0.0.40
codegen_flags: <defaults>
</compile_context>

<pallas_src>
import functools

import jax
import jax.numpy as jnp
from jax.experimental import pallas as pl
from jax.experimental.pallas import tpu as pltpu


def _mpjpe_kernel(pred_ref, gt_ref, out_ref, *, d, tile_n, n_points, inv_count):
    """Accumulate sum of per-point L2 distances into the resident (1,1) output."""
    i = pl.program_id(0)

    @pl.when(i == 0)
    def _():
        out_ref[...] = jnp.zeros_like(out_ref)

    # Squared L2 over the (small, static) coordinate axis, one sublane row at a
    # time: largest live temporary stays (1, tile_n).
    dk = gt_ref[0:1, :].astype(jnp.float32) - pred_ref[0:1, :].astype(jnp.float32)
    sumsq = dk * dk
    for k in range(1, d):
        dk = gt_ref[k:k + 1, :].astype(jnp.float32) - pred_ref[k:k + 1, :].astype(
            jnp.float32)
        sumsq = sumsq + dk * dk

    dist = jnp.sqrt(sumsq)  # (1, tile_n)

    # Mask lanes past the real number of points.  There is no wrapper padding,
    # so the overhang of the last block holds undefined data (possibly inf/nan);
    # the select keeps it out of the sum.
    lane = jax.lax.broadcasted_iota(jnp.int32, (1, tile_n), 1)
    valid = (i * tile_n + lane) < n_points
    masked = jnp.where(valid, dist, 0.0)

    # Per-step cross-lane reduce into the resident (1,1) output accumulator
    # (XLU work hides under the DMA in this memory-bound kernel).
    out_ref[...] += jnp.sum(masked, axis=1, keepdims=True)

    @pl.when(i == pl.num_programs(0) - 1)
    def _():
        out_ref[...] = out_ref[...] * jnp.float32(inv_count)


def mpjpe_loss(pred_pose, gt_pose, *, max_tile_n=65536, small_n_threshold=65536):
    """Mean per-joint position error. pred/gt: (..., D). Returns scalar f32.

    small_n_threshold: below this number of points, bypass Pallas entirely
    (fused XLA is faster there; wrapper copies + launch overhead dominate).
    Pass 0 to force the Pallas kernel.
    """
    assert pred_pose.shape == gt_pose.shape
    assert max_tile_n > 0 and max_tile_n % 128 == 0
    d = pred_pose.shape[-1]
    n = 1
    for s in pred_pose.shape[:-1]:
        n *= s

    if n < small_n_threshold:
        diff = gt_pose.astype(jnp.float32) - pred_pose.astype(jnp.float32)
        return jnp.mean(jnp.sqrt(jnp.sum(diff * diff, axis=-1)))

    # Lane-dense (D, N) layout: one XLA transpose copy in the wrapper — the only
    # extra HBM pass (the pad pass is gone; overhang is masked in-kernel).
    pred2d = pred_pose.reshape(n, d).T
    gt2d = gt_pose.reshape(n, d).T

    # Tile width: multiple of 128, capped so (8-sublane-padded) blocks fit VMEM
    # comfortably on v5e/v6e/v7x.  Small n collapses to a single grid step.
    tile_n = min(max_tile_n, ((n + 127) // 128) * 128)
    grid = (pl.cdiv(n, tile_n),)

    kernel = functools.partial(
        _mpjpe_kernel, d=d, tile_n=tile_n, n_points=n, inv_count=1.0 / float(n))

    cost = pl.CostEstimate(
        flops=int((3 * d + 2) * n),        # subs + muls + adds per point
        transcendentals=int(n),            # one sqrt per point
        bytes_accessed=int(2 * d * n * 4 + 4),
    )

    out = pl.pallas_call(
        kernel,
        out_shape=jax.ShapeDtypeStruct((1, 1), jnp.float32),
        grid_spec=pltpu.PrefetchScalarGridSpec(
            num_scalar_prefetch=0,
            grid=grid,
            in_specs=[
                pl.BlockSpec((d, tile_n), lambda i: (0, i)),
                pl.BlockSpec((d, tile_n), lambda i: (0, i)),
            ],
            # Resident (1,1) output doubles as the accumulator across the
            # reduction axis; written back to HBM once.
            out_specs=pl.BlockSpec((1, 1), lambda i: (0, 0)),
        ),
        compiler_params=pltpu.CompilerParams(
            dimension_semantics=("arbitrary",),
            vmem_limit_bytes=32 * 1024 * 1024,
        ),
        cost_estimate=cost,
    )(pred2d, gt2d)
    return out[0, 0]


if __name__ == "__main__":
    key = jax.random.PRNGKey(0)
    k1, k2, k3, k4 = jax.random.split(key, 4)

    # (batch, joints, 3) pose tensors — small demo shapes.
    B, J, D = 2, 16, 3
    pred = jax.random.normal(k1, (B, J, D), dtype=jnp.float32)
    gt = jax.random.normal(k2, (B, J, D), dtype=jnp.float32)
    ref = jnp.mean(jnp.linalg.norm(gt - pred, axis=-1))

    # 1) Force the Pallas kernel path on the small input (single partial block).
    loss_kernel = jax.block_until_ready(mpjpe_loss(pred, gt, small_n_threshold=0))
    assert jnp.allclose(loss_kernel, ref, rtol=1e-5, atol=1e-5), (loss_kernel, ref)

    # 2) Default path (small-n fast path, plain fused XLA).
    loss_fast = jax.block_until_ready(mpjpe_loss(pred, gt))
    assert jnp.allclose(loss_fast, ref, rtol=1e-5, atol=1e-5), (loss_fast, ref)

    # 3) Multi-step grid with a partial, masked last block (n=2100, tile=128).
    B2, J2 = 3, 700
    pred2 = jax.random.normal(k3, (B2, J2, D), dtype=jnp.float32)
    gt2 = jax.random.normal(k4, (B2, J2, D), dtype=jnp.float32)
    ref2 = jnp.mean(jnp.linalg.norm(gt2 - pred2, axis=-1))
    loss2 = jax.block_until_ready(
        mpjpe_loss(pred2, gt2, max_tile_n=128, small_n_threshold=0))
    assert jnp.allclose(loss2, ref2, rtol=1e-5, atol=1e-5), (loss2, ref2)

    print("KERNEL_OK")
</pallas_src>

<mosaic_0001>
module attributes {stable_mosaic.version = 11 : i64} {
  func.func @_mpjpe_kernel(%arg0: i32, %arg1: memref<3x128xf32, #tpu.memory_space<vmem>>, %arg2: memref<3x128xf32, #tpu.memory_space<vmem>>, %arg3: memref<1x1xf32, #tpu.memory_space<vmem>>) attributes {dimension_semantics = [#tpu.dimension_semantics<arbitrary>], iteration_bounds = array<i64: 1>, scalar_prefetch = 0 : i64, scratch_operands = 0 : i64, tpu.core_type = #tpu.core_type<tc>, window_params = [{transform_indices = @transform_0, window_bounds = array<i64: 3, 128>}, {transform_indices = @transform_1, window_bounds = array<i64: 3, 128>}, {pipeline_mode = #tpu.pipeline_mode<synchronous>, transform_indices = @transform_2, window_bounds = array<i64: 1, 1>}]} {
    %c0_i32 = arith.constant 0 : i32
    %0 = arith.cmpi eq, %arg0, %c0_i32 : i32
    %1 = arith.extui %0 : i1 to i32
    %c0_i32_0 = arith.constant 0 : i32
    %2 = arith.cmpi ne, %1, %c0_i32_0 : i32
    scf.if %2 {
      %cst_17 = arith.constant 0.000000e+00 : f32
      %34 = vector.broadcast %cst_17 : f32 to vector<1x1xf32>
      %c0_18 = arith.constant 0 : index
      %c0_19 = arith.constant 0 : index
      %35 = vector.load %arg3[%c0_18, %c0_19] : memref<1x1xf32, #tpu.memory_space<vmem>>, vector<1x1xf32>
      tpu.vector_store %arg3[%c0_18, %c0_19], %34 {strides = array<i32>} : memref<1x1xf32, #tpu.memory_space<vmem>>, vector<1x1xf32>,
    } else {
    }
    %c0 = arith.constant 0 : index
    %c0_1 = arith.constant 0 : index
    %3 = vector.load %arg2[%c0, %c0_1] : memref<3x128xf32, #tpu.memory_space<vmem>>, vector<1x128xf32>
    %c0_2 = arith.constant 0 : index
    %c0_3 = arith.constant 0 : index
    %4 = vector.load %arg1[%c0_2, %c0_3] : memref<3x128xf32, #tpu.memory_space<vmem>>, vector<1x128xf32>
    %5 = arith.subf %3, %4 : vector<1x128xf32>
    %6 = arith.mulf %5, %5 : vector<1x128xf32>
    %c1 = arith.constant 1 : index
    %c0_4 = arith.constant 0 : index
    %7 = vector.load %arg2[%c1, %c0_4] : memref<3x128xf32, #tpu.memory_space<vmem>>, vector<1x128xf32>
    %c1_5 = arith.constant 1 : index
    %c0_6 = arith.constant 0 : index
    %8 = vector.load %arg1[%c1_5, %c0_6] : memref<3x128xf32, #tpu.memory_space<vmem>>, vector<1x128xf32>
    %9 = arith.subf %7, %8 : vector<1x128xf32>
    %10 = arith.mulf %9, %9 : vector<1x128xf32>
    %11 = arith.addf %6, %10 : vector<1x128xf32>
    %c2 = arith.constant 2 : index
    %c0_7 = arith.constant 0 : index
    %12 = vector.load %arg2[%c2, %c0_7] : memref<3x128xf32, #tpu.memory_space<vmem>>, vector<1x128xf32>
    %c2_8 = arith.constant 2 : index
    %c0_9 = arith.constant 0 : index
    %13 = vector.load %arg1[%c2_8, %c0_9] : memref<3x128xf32, #tpu.memory_space<vmem>>, vector<1x128xf32>
    %14 = arith.subf %12, %13 : vector<1x128xf32>
    %15 = arith.mulf %14, %14 : vector<1x128xf32>
    %16 = arith.addf %11, %15 : vector<1x128xf32>
    %17 = math.sqrt %16 : vector<1x128xf32>
    %18 = tpu.iota {dimensions = array<i32: 1>} : vector<1x128xi32>
    %c128_i32 = arith.constant 128 : i32
    %19 = arith.muli %arg0, %c128_i32 : i32
    %20 = vector.broadcast %19 : i32 to vector<1x128xi32>
    %21 = arith.addi %20, %18 : vector<1x128xi32>
    %c32_i32 = arith.constant 32 : i32
    %22 = vector.broadcast %c32_i32 : i32 to vector<1x128xi32>
    %23 = arith.cmpi slt, %21, %22 : vector<1x128xi32>
    %cst = arith.constant 0.000000e+00 : f32
    %24 = vector.broadcast %cst : f32 to vector<1x128xf32>
    %25 = arith.select %23, %17, %24 : vector<1x128xi1>, vector<1x128xf32>
    %c0_10 = arith.constant 0 : index
    %c0_11 = arith.constant 0 : index
    %26 = vector.load %arg3[%c0_10, %c0_11] : memref<1x1xf32, #tpu.memory_space<vmem>>, vector<1x1xf32>
    %cst_12 = arith.constant dense<0.000000e+00> : vector<1xf32>
    %27 = vector.multi_reduction <add>, %25, %cst_12 [1] : vector<1x128xf32> to vector<1xf32>
    %28 = vector.shape_cast %27 : vector<1xf32> to vector<1x1xf32>
    %29 = arith.addf %26, %28 : vector<1x1xf32>
    %c0_13 = arith.constant 0 : index
    %c0_14 = arith.constant 0 : index
    %30 = vector.load %arg3[%c0_13, %c0_14] : memref<1x1xf32, #tpu.memory_space<vmem>>, vector<1x1xf32>
    tpu.vector_store %arg3[%c0_13, %c0_14], %29 {strides = array<i32>} : memref<1x1xf32, #tpu.memory_space<vmem>>, vector<1x1xf32>,
    %c0_i32_15 = arith.constant 0 : i32
    %31 = arith.cmpi eq, %arg0, %c0_i32_15 : i32
    %32 = arith.extui %31 : i1 to i32
    %c0_i32_16 = arith.constant 0 : i32
    %33 = arith.cmpi ne, %32, %c0_i32_16 : i32
    scf.if %33 {
      %c0_17 = arith.constant 0 : index
      %c0_18 = arith.constant 0 : index
      %34 = vector.load %arg3[%c0_17, %c0_18] : memref<1x1xf32, #tpu.memory_space<vmem>>, vector<1x1xf32>
      %cst_19 = arith.constant 3.125000e-02 : f32
      %35 = vector.broadcast %cst_19 : f32 to vector<1x1xf32>
      %36 = arith.mulf %34, %35 : vector<1x1xf32>
      %c0_20 = arith.constant 0 : index
      %c0_21 = arith.constant 0 : index
      %37 = vector.load %arg3[%c0_20, %c0_21] : memref<1x1xf32, #tpu.memory_space<vmem>>, vector<1x1xf32>
      tpu.vector_store %arg3[%c0_20, %c0_21], %36 {strides = array<i32>} : memref<1x1xf32, #tpu.memory_space<vmem>>, vector<1x1xf32>,
    } else {
    }
    return
  }
  func.func @transform_0(%arg0: i32) -> (i32, i32) {
    %c0_i32 = arith.constant 0 : i32
    %c0_i32_0 = arith.constant 0 : i32
    return %c0_i32, %arg0 : i32, i32
  }
  func.func @transform_1(%arg0: i32) -> (i32, i32) {
    %c0_i32 = arith.constant 0 : i32
    %c0_i32_0 = arith.constant 0 : i32
    return %c0_i32, %arg0 : i32, i32
  }
  func.func @transform_2(%arg0: i32) -> (i32, i32) {
    %c0_i32 = arith.constant 0 : i32
    %c0_i32_0 = arith.constant 0 : i32
    %c0_i32_1 = arith.constant 0 : i32
    return %c0_i32, %c0_i32_0 : i32, i32
  }
}

</mosaic_0001>

<bundles_post_ra>
// kernel: tpu_custom_call.1
= control target key start
LH: loop header
LB: loop body
LE: loop exit
PB: predicated region body
PF: predicated region fallthrough
CT: control target
= control target key end

     0   :  { %7 = vsyncpa [#allocation3], 0  ;;  %s203_s0 = inlined_call_operand.hbm [shape: f32[3,32], index: 0, kind: input, shape index: {}]   ;;  %s204_s1 = inlined_call_operand.hbm [shape: f32[3,32], index: 1, kind: input, shape index: {}]   ;;  %s205_s2 = inlined_call_operand.hbm [shape: f32[1,1], index: 2, kind: output, shape index: {}]  }
   0x1   :  { %8 = vsyncpa [#allocation6], 0 }
   0x2   :  { %9 = vsyncpa [#allocation4], 0  ;;  %s172_s9 = smov [#allocation2]   ;;  %s173_s11 = smov [#allocation5]  }
   0x3   :  { %s16_s10 = sshll.u32 %s172_s9, 4  ;;  %s26_s12 = sshll.u32 %s173_s11, 4  ;;  %s17_s10 = int_to_ptr.vmem [resolvable:$true] %s16_s10  ;;  %s27_s12 = int_to_ptr.vmem [resolvable:$true] %s26_s12 }
   0x4   :  { %s114_s13 = scalar_lea.vmem %s17_s10, 64  ;;  %p119_p1 = scmp.lt.s32.totalorder %s17_s10, %s17_s10 }
   0x5   :  { %p115_p0 = scmp.ne.s32.totalorder %s17_s10, %s114_s13  ;;  %p120_p2 = scmp.lt.s32.totalorder %s114_s13, %s114_s13 }
   0x7   :  { %p121_p3 = por %p120_p2, %p119_p1 }
   0x9   :  { %p122_p4 = pnand %p121_p3, %p115_p0 }
   0xb   :  { %125 = shalt.err (!%p122_p4)
}
   0xc   :  { %19 = dma.hbm_to_vmem [thread:$0]  %s203_s0, 64, %s17_s10, [#allocation3]  }
   0xd   :  { %s134_s16 = scalar_lea.vmem %s27_s12, 64  ;;  %p139_p6 = scmp.lt.s32.totalorder %s27_s12, %s27_s12 }
   0xe   :  { %p135_p5 = scmp.ne.s32.totalorder %s27_s12, %s134_s16  ;;  %p140_p7 = scmp.lt.s32.totalorder %s134_s16, %s134_s16 }
  0x10   :  { %p141_p8 = por %p140_p7, %p139_p6 }
  0x12   :  { %p142_p9 = pnand %p141_p8, %p135_p5 }
  0x14   :  { %145 = shalt.err (!%p142_p9)
}
  0x15   :  { %29 = dma.hbm_to_vmem [thread:$0]  %s204_s1, 64, %s27_s12, [#allocation6]  }
  0x16   :  { %166 = dma.done.wait [#allocation3], 64  }
  0x17   :  { %167 = vsyncadd [#allocation3], 4294967232 }
  0x18   :  { %168 = dma.done.wait [#allocation6], 64  }
  0x19   :  { %169 = vsyncadd [#allocation6], 4294967232  ;;  %vm40_vm0 = vcmask 0   ;;  %v174_v0 = vmov 0.0   ;;  %v42_v1 = vld [vmem:[#allocation5] sm:$0x1]  ;;  %v63_v15 = vlaneseq }
  0x1a   :  { %41 = vst.msk [vmem:[#allocation7] sm:$0x1] %vm40_vm0, %v174_v0  ;;  %v43_v2 = vld [vmem:[#allocation2] sm:$0x1]  ;;  %v46_v3 = vld [vmem:[#allocation5 + $0x1] sm:$0x1] }
  0x1b   :  { %v44_v4 = vsub.f32 %v42_v1, %v43_v2  ;;  %v47_v5 = vld [vmem:[#allocation2 + $0x1] sm:$0x1]  ;;  %v51_v6 = vld [vmem:[#allocation5 + $0x2] sm:$0x1]  ;;  %v52_v7 = vld [vmem:[#allocation2 + $0x2] sm:$0x1] }
  0x1c   :  { %v48_v8 = vsub.f32 %v46_v3, %v47_v5  ;;  %v53_v9 = vsub.f32 %v51_v6, %v52_v7  ;;  %v64_v16 = vand.u32 127, %v63_v15  ;;  %vm71_vm4 = vcmask 1040384   ;;  %s175_s0 = smov [#allocation7]  }
  0x1d   :  { %v45_v10 = vmul.f32 %v44_v4, %v44_v4  ;;  %s90_s1 = sshll.u32 %s175_s0, 4  ;;  %s91_s1 = int_to_ptr.vmem [resolvable:$true] %s90_s1 }
  0x1e   :  { %v49_v11 = vmul.f32 %v48_v8, %v48_v8  ;;  %v54_v12 = vmul.f32 %v53_v9, %v53_v9  ;;  %vm68_vm3 = vcmp.lt.s32.totalorder %v64_v16, 32  ;;  %s146_s19 = scalar_lea.vmem %s91_s1, 16  ;;  %s150_s20 = scalar_lea.vmem %s91_s1, 32 }
  0x1f   :  { %p147_p10 = scmp.ne.s32.totalorder %s91_s1, %s146_s19  ;;  %p151_p11 = scmp.lt.s32.totalorder %s91_s1, %s91_s1 }
  0x20   :  { %v50_v13 = vadd.f32 %v49_v11, %v45_v10  ;;  %p152_p12 = scmp.lt.s32.totalorder %s150_s20, %s146_s19 }
  0x21   :  { %v70_v24 = vld [vmem:[#allocation7] sm:$0x1] }
  0x22   :  { %v55_v14 = vadd.f32 %v54_v12, %v50_v13  ;;  %p153_p13 = por %p152_p12, %p151_p11 }
  0x24   :  { %104 = vrsqrt.f32 %v55_v14  ;;  %vm58_vm1 = vcmp.eq.f32.partialorder %v55_v14, inf  ;;  %v61_v18 = vand.u32 2147483648, %v55_v14  ;;  %vm60_vm2 = vcmp.eq.f32.partialorder %v55_v14, 0.0  ;;  %p154_p0 = pnand %p153_p13, %p147_p10 }
  0x31   :  { %v105_v17 = vpop.eup %104 }
  0x32   :  { %v57_v19 = vmul.f32 %v105_v17, %v55_v14 }
  0x34   :  { %v59_v20 = vsel %vm58_vm1, %v55_v14, %v57_v19 }
  0x35   :  { %v62_v21 = vsel %vm60_vm2, %v61_v18, %v59_v20 }
  0x36   :  { %v69_v22 = vsel %vm68_vm3, %v62_v21, 0.0 }
  0x37   :  { %v72_v23 = vsel %vm71_vm4, %v69_v22, 0.0 }
  0x38   :  { %73 = vadd.xlane.f32.xlu0 %v72_v23 }
  0xc1   :  { %v74_v25 = vpop.xlane.xlu0 %73 }
  0xc2   :  { %v75_v26 = vadd.f32 %v74_v25, %v70_v24 }
  0xc4   :  { %77 = vst.msk [vmem:[#allocation7] sm:$0x1] %vm40_vm0, %v75_v26 }
  0xcb   :  { %v81_v27 = vld [vmem:[#allocation7] sm:$0x1] }
  0xcc   :  { %v82_v28 = vmul.f32 0.03125, %v81_v27 }
  0xce   :  { %83 = vst.msk [vmem:[#allocation7] sm:$0x1] %vm40_vm0, %v82_v28 }
  0xcf   :  { %157 = shalt.err (!%p154_p0)
}
  0xd0   :  { %93 = dma.vmem_to_hbm [thread:$0]  %s91_s1, 16, %s205_s2, [#allocation4]  }
  0xd1   :  { %170 = dma.done.wait [#allocation4], 16  }
  0xd2   :  { %171 = vsyncadd [#allocation4], 4294967280 }
  0xd3   :  { %97 = vsyncpa [#allocation3], 1 }
  0xd4   :  { %98 = vsyncpa [#allocation6], 1 }
  0xd5   :  { %99 = vsyncpa [#allocation4], 1 }

</bundles_post_ra>
